<compile_context>
chip_gen: v7x
topology: tpu7x:2x2x1
jax: 0.10.0
libtpu: 0.0.40
codegen_flags: <defaults>
</compile_context>

<pallas_src>
import functools

import jax
import jax.numpy as jnp
from jax.experimental import pallas as pl
from jax.experimental.pallas import tpu as pltpu

LANE = 128  # TB (batch tile) lives on the lane axis -> multiple of 128


def _round_up(x, m):
    return (x + m - 1) // m * m


def _pick_elementwise_dtype():
    """bf16 elementwise math on bf16-capable VPU/EUP (v6e/v7x), f32 otherwise."""
    try:
        kind = jax.devices()[0].device_kind.lower()
    except Exception:
        return jnp.float32
    if any(v in kind for v in ("v2", "v3", "v4", "v5")):
        return jnp.float32
    return jnp.bfloat16


def _autoencoder_kernel(n_layers, *refs):
    # refs = (x_ref, w0, b0, w1, b1, ..., w{n-1}, b{n-1}, out_ref)
    # x_ref:   (input_dim, TB)      in the MXU dtype (bf16 or f32)
    # w_i:     (out_i, in_i)        MXU dtype  (PyTorch layout)
    # b_i:     (out_i, 1)           elementwise dtype (bf16 on v6e/v7x, else f32)
    # out_ref: (out_dim, TB)
    x_ref = refs[0]
    out_ref = refs[-1]
    params = refs[1:-1]

    mxu_dtype = params[0].dtype   # weight dtype (bf16 perf path / f32 test path)
    ew_dtype = params[1].dtype    # bias dtype drives the elementwise precision

    h = x_ref[...]                # (in_dim, TB), batch on lanes
    for i in range(n_layers):
        w = params[2 * i][...]
        b = params[2 * i + 1][...]
        acc = jnp.dot(w, h, preferred_element_type=jnp.float32)   # (out_i, TB) f32
        if i != n_layers - 1:
            a = acc.astype(ew_dtype) + b      # lane-dense bias add
            a = jnp.tanh(a)                   # EUP, lane-dense
            h = a.astype(mxu_dtype)           # no-op when ew == mxu dtype (bf16)
        else:
            h = acc + b.astype(jnp.float32)   # final Linear: keep f32, no tanh
    out_ref[...] = h.astype(out_ref.dtype)


def deep_autoencoder_forward(x, params, *, block_batch=2048,
                             matmul_dtype=jnp.bfloat16,
                             elementwise_dtype=None):
    """x: (batch, input_dim). params: list of (W, b) with W (out, in), b (out, 1)."""
    orig_dtype = x.dtype
    batch, input_dim = x.shape
    n_layers = len(params)
    out_dim = params[-1][0].shape[0]

    if elementwise_dtype is None:
        elementwise_dtype = (jnp.float32 if matmul_dtype == jnp.float32
                             else _pick_elementwise_dtype())

    # --- batch tiling: TB is the lane axis -> multiple of 128 ----------------
    tb = max(LANE, min(block_batch, _round_up(batch, LANE)))
    tb = _round_up(tb, LANE)
    batch_pad = _round_up(batch, tb)
    grid = (batch_pad // tb,)

    # --- transposed, lane-dense activation layout: (features, batch) ---------
    x_t = x.T                                   # (input_dim, batch)
    if batch_pad != batch:
        x_t = jnp.pad(x_t, ((0, 0), (0, batch_pad - batch)))
    x_cast = x_t.astype(matmul_dtype)

    flat = []
    for w, b in params:
        flat.append(w.astype(matmul_dtype))         # (out, in)  -> MXU
        flat.append(b.astype(elementwise_dtype))    # (out, 1)   -> VPU/EUP

    # --- specs ----------------------------------------------------------------
    in_specs = [pl.BlockSpec((input_dim, tb), lambda i: (0, i))]
    for w, b in params:
        in_specs.append(pl.BlockSpec(w.shape, lambda i: (0, 0)))   # VMEM-resident
        in_specs.append(pl.BlockSpec(b.shape, lambda i: (0, 0)))   # VMEM-resident
    out_specs = pl.BlockSpec((out_dim, tb), lambda i: (0, i))      # lane-dense store

    kernel = functools.partial(_autoencoder_kernel, n_layers)

    out_t = pl.pallas_call(
        kernel,
        out_shape=jax.ShapeDtypeStruct((out_dim, batch_pad), orig_dtype),
        grid=grid,
        in_specs=in_specs,
        out_specs=out_specs,
        compiler_params=pltpu.CompilerParams(
            dimension_semantics=("parallel",),       # shard batch across TCs (v7x)
            vmem_limit_bytes=32 * 1024 * 1024,
        ),
    )(x_cast, *flat)

    return out_t[:, :batch].T                        # (batch, out_dim)


def init_params(key, input_dim, hidden_dims, bottleneck_dim):
    """Mimics torch.nn.Linear default init; W in PyTorch layout (out, in), b (out, 1)."""
    dims = (
        [input_dim] + list(hidden_dims) + [bottleneck_dim]          # encoder
        + list(reversed(hidden_dims)) + [input_dim]                 # decoder
    )
    params = []
    for i in range(len(dims) - 1):
        fan_in, fan_out = dims[i], dims[i + 1]
        key, kw, kb = jax.random.split(key, 3)
        bound = 1.0 / jnp.sqrt(fan_in)
        w = jax.random.uniform(kw, (fan_out, fan_in), jnp.float32, -bound, bound)
        b = jax.random.uniform(kb, (fan_out, 1), jnp.float32, -bound, bound)
        params.append((w, b))
    return params


def reference_forward(x, params):
    h = x
    n = len(params)
    for i, (w, b) in enumerate(params):
        h = h @ w.T + b[:, 0]
        if i != n - 1:
            h = jnp.tanh(h)
    return h


if __name__ == "__main__":
    # Small shapes consistent with the module's constructor signature.
    batch = 200                 # deliberately NOT a multiple of the batch tile
    input_dim = 32
    hidden_dims = [64, 48, 32, 16]
    bottleneck_dim = 8
    # Demo-only tile so grid > 1 is exercised at this tiny batch; the production
    # default is block_batch=2048 (>= one full MXU N-pass per layer, fewer
    # grid-step overheads).
    demo_block_batch = 128

    key = jax.random.PRNGKey(0)
    key, kx = jax.random.split(key)
    x = jax.random.normal(kx, (batch, input_dim), jnp.float32)

    params = init_params(key, input_dim, hidden_dims, bottleneck_dim)
    ref = reference_forward(x, params)

    # 1) exact-dtype (f32) path: tight correctness check (test-only path).
    out_f32 = deep_autoencoder_forward(
        x, params, block_batch=demo_block_batch,
        matmul_dtype=jnp.float32, elementwise_dtype=jnp.float32)
    out_f32 = jax.block_until_ready(out_f32)
    assert out_f32.shape == (batch, input_dim)
    assert jnp.allclose(out_f32, ref, atol=2e-5, rtol=2e-5), "f32 mismatch vs reference"

    # 2) performance path: bf16 MXU inputs, f32 accumulation, per-generation
    #    elementwise dtype (bf16 on v6e/v7x, f32 on v5e).
    out_perf = deep_autoencoder_forward(
        x, params, block_batch=demo_block_batch)
    out_perf = jax.block_until_ready(out_perf)
    assert out_perf.shape == (batch, input_dim)
    assert jnp.allclose(out_perf, ref, atol=5e-2, rtol=5e-2), "bf16 mismatch vs reference"

    print("KERNEL_OK")
</pallas_src>

<mosaic_0001>
module attributes {stable_mosaic.version = 11 : i64} {
  func.func @_autoencoder_kernel(%arg0: i32, %arg1: memref<32x128xf32, #tpu.memory_space<vmem>>, %arg2: memref<64x32xf32, #tpu.memory_space<vmem>>, %arg3: memref<64x1xf32, #tpu.memory_space<vmem>>, %arg4: memref<48x64xf32, #tpu.memory_space<vmem>>, %arg5: memref<48x1xf32, #tpu.memory_space<vmem>>, %arg6: memref<32x48xf32, #tpu.memory_space<vmem>>, %arg7: memref<32x1xf32, #tpu.memory_space<vmem>>, %arg8: memref<16x32xf32, #tpu.memory_space<vmem>>, %arg9: memref<16x1xf32, #tpu.memory_space<vmem>>, %arg10: memref<8x16xf32, #tpu.memory_space<vmem>>, %arg11: memref<8x1xf32, #tpu.memory_space<vmem>>, %arg12: memref<16x8xf32, #tpu.memory_space<vmem>>, %arg13: memref<16x1xf32, #tpu.memory_space<vmem>>, %arg14: memref<32x16xf32, #tpu.memory_space<vmem>>, %arg15: memref<32x1xf32, #tpu.memory_space<vmem>>, %arg16: memref<48x32xf32, #tpu.memory_space<vmem>>, %arg17: memref<48x1xf32, #tpu.memory_space<vmem>>, %arg18: memref<64x48xf32, #tpu.memory_space<vmem>>, %arg19: memref<64x1xf32, #tpu.memory_space<vmem>>, %arg20: memref<32x64xf32, #tpu.memory_space<vmem>>, %arg21: memref<32x1xf32, #tpu.memory_space<vmem>>, %arg22: memref<32x128xf32, #tpu.memory_space<vmem>>) attributes {dimension_semantics = [#tpu.dimension_semantics<parallel>], iteration_bounds = array<i64: 2>, scalar_prefetch = 0 : i64, scratch_operands = 0 : i64, tpu.core_type = #tpu.core_type<tc>, window_params = [{transform_indices = @transform_0, window_bounds = array<i64: 32, 128>}, {pipeline_mode = #tpu.pipeline_mode<synchronous>, transform_indices = @transform_1, window_bounds = array<i64: 64, 32>}, {pipeline_mode = #tpu.pipeline_mode<synchronous>, transform_indices = @transform_2, window_bounds = array<i64: 64, 1>}, {pipeline_mode = #tpu.pipeline_mode<synchronous>, transform_indices = @transform_3, window_bounds = array<i64: 48, 64>}, {pipeline_mode = #tpu.pipeline_mode<synchronous>, transform_indices = @transform_4, window_bounds = array<i64: 48, 1>}, {pipeline_mode = #tpu.pipeline_mode<synchronous>, transform_indices = @transform_5, window_bounds = array<i64: 32, 48>}, {pipeline_mode = #tpu.pipeline_mode<synchronous>, transform_indices = @transform_6, window_bounds = array<i64: 32, 1>}, {pipeline_mode = #tpu.pipeline_mode<synchronous>, transform_indices = @transform_7, window_bounds = array<i64: 16, 32>}, {pipeline_mode = #tpu.pipeline_mode<synchronous>, transform_indices = @transform_8, window_bounds = array<i64: 16, 1>}, {pipeline_mode = #tpu.pipeline_mode<synchronous>, transform_indices = @transform_9, window_bounds = array<i64: 8, 16>}, {pipeline_mode = #tpu.pipeline_mode<synchronous>, transform_indices = @transform_10, window_bounds = array<i64: 8, 1>}, {pipeline_mode = #tpu.pipeline_mode<synchronous>, transform_indices = @transform_11, window_bounds = array<i64: 16, 8>}, {pipeline_mode = #tpu.pipeline_mode<synchronous>, transform_indices = @transform_12, window_bounds = array<i64: 16, 1>}, {pipeline_mode = #tpu.pipeline_mode<synchronous>, transform_indices = @transform_13, window_bounds = array<i64: 32, 16>}, {pipeline_mode = #tpu.pipeline_mode<synchronous>, transform_indices = @transform_14, window_bounds = array<i64: 32, 1>}, {pipeline_mode = #tpu.pipeline_mode<synchronous>, transform_indices = @transform_15, window_bounds = array<i64: 48, 32>}, {pipeline_mode = #tpu.pipeline_mode<synchronous>, transform_indices = @transform_16, window_bounds = array<i64: 48, 1>}, {pipeline_mode = #tpu.pipeline_mode<synchronous>, transform_indices = @transform_17, window_bounds = array<i64: 64, 48>}, {pipeline_mode = #tpu.pipeline_mode<synchronous>, transform_indices = @transform_18, window_bounds = array<i64: 64, 1>}, {pipeline_mode = #tpu.pipeline_mode<synchronous>, transform_indices = @transform_19, window_bounds = array<i64: 32, 64>}, {pipeline_mode = #tpu.pipeline_mode<synchronous>, transform_indices = @transform_20, window_bounds = array<i64: 32, 1>}, {transform_indices = @transform_21, window_bounds = array<i64: 32, 128>}]} {
    %c0 = arith.constant 0 : index
    %c0_0 = arith.constant 0 : index
    %0 = vector.load %arg1[%c0, %c0_0] : memref<32x128xf32, #tpu.memory_space<vmem>>, vector<32x128xf32>
    %c0_1 = arith.constant 0 : index
    %c0_2 = arith.constant 0 : index
    %1 = vector.load %arg2[%c0_1, %c0_2] : memref<64x32xf32, #tpu.memory_space<vmem>>, vector<64x32xf32>
    %c0_3 = arith.constant 0 : index
    %c0_4 = arith.constant 0 : index
    %2 = vector.load %arg3[%c0_3, %c0_4] : memref<64x1xf32, #tpu.memory_space<vmem>>, vector<64x1xf32>
    %cst = arith.constant dense<0.000000e+00> : vector<64x128xf32>
    %3 = tpu.matmul %1, %0, %cst {dimension_numbers = #tpu.dot_dimension_numbers<[1], [0], [0], [1], [0, 0, 1, 1], [], []>} : vector<64x32xf32>, vector<32x128xf32>, vector<64x128xf32> -> vector<64x128xf32>
    %4 = vector.broadcast %2 : vector<64x1xf32> to vector<64x128xf32>
    %5 = arith.addf %3, %4 : vector<64x128xf32>
    %6 = math.tanh %5 : vector<64x128xf32>
    %c0_5 = arith.constant 0 : index
    %c0_6 = arith.constant 0 : index
    %7 = vector.load %arg4[%c0_5, %c0_6] : memref<48x64xf32, #tpu.memory_space<vmem>>, vector<48x64xf32>
    %c0_7 = arith.constant 0 : index
    %c0_8 = arith.constant 0 : index
    %8 = vector.load %arg5[%c0_7, %c0_8] : memref<48x1xf32, #tpu.memory_space<vmem>>, vector<48x1xf32>
    %cst_9 = arith.constant dense<0.000000e+00> : vector<48x128xf32>
    %9 = tpu.matmul %7, %6, %cst_9 {dimension_numbers = #tpu.dot_dimension_numbers<[1], [0], [0], [1], [0, 0, 1, 1], [], []>} : vector<48x64xf32>, vector<64x128xf32>, vector<48x128xf32> -> vector<48x128xf32>
    %10 = vector.broadcast %8 : vector<48x1xf32> to vector<48x128xf32>
    %11 = arith.addf %9, %10 : vector<48x128xf32>
    %12 = math.tanh %11 : vector<48x128xf32>
    %c0_10 = arith.constant 0 : index
    %c0_11 = arith.constant 0 : index
    %13 = vector.load %arg6[%c0_10, %c0_11] : memref<32x48xf32, #tpu.memory_space<vmem>>, vector<32x48xf32>
    %c0_12 = arith.constant 0 : index
    %c0_13 = arith.constant 0 : index
    %14 = vector.load %arg7[%c0_12, %c0_13] : memref<32x1xf32, #tpu.memory_space<vmem>>, vector<32x1xf32>
    %cst_14 = arith.constant dense<0.000000e+00> : vector<32x128xf32>
    %15 = tpu.matmul %13, %12, %cst_14 {dimension_numbers = #tpu.dot_dimension_numbers<[1], [0], [0], [1], [0, 0, 1, 1], [], []>} : vector<32x48xf32>, vector<48x128xf32>, vector<32x128xf32> -> vector<32x128xf32>
    %16 = vector.broadcast %14 : vector<32x1xf32> to vector<32x128xf32>
    %17 = arith.addf %15, %16 : vector<32x128xf32>
    %18 = math.tanh %17 : vector<32x128xf32>
    %c0_15 = arith.constant 0 : index
    %c0_16 = arith.constant 0 : index
    %19 = vector.load %arg8[%c0_15, %c0_16] : memref<16x32xf32, #tpu.memory_space<vmem>>, vector<16x32xf32>
    %c0_17 = arith.constant 0 : index
    %c0_18 = arith.constant 0 : index
    %20 = vector.load %arg9[%c0_17, %c0_18] : memref<16x1xf32, #tpu.memory_space<vmem>>, vector<16x1xf32>
    %cst_19 = arith.constant dense<0.000000e+00> : vector<16x128xf32>
    %21 = tpu.matmul %19, %18, %cst_19 {dimension_numbers = #tpu.dot_dimension_numbers<[1], [0], [0], [1], [0, 0, 1, 1], [], []>} : vector<16x32xf32>, vector<32x128xf32>, vector<16x128xf32> -> vector<16x128xf32>
    %22 = vector.broadcast %20 : vector<16x1xf32> to vector<16x128xf32>
    %23 = arith.addf %21, %22 : vector<16x128xf32>
    %24 = math.tanh %23 : vector<16x128xf32>
    %c0_20 = arith.constant 0 : index
    %c0_21 = arith.constant 0 : index
    %25 = vector.load %arg10[%c0_20, %c0_21] : memref<8x16xf32, #tpu.memory_space<vmem>>, vector<8x16xf32>
    %c0_22 = arith.constant 0 : index
    %c0_23 = arith.constant 0 : index
    %26 = vector.load %arg11[%c0_22, %c0_23] : memref<8x1xf32, #tpu.memory_space<vmem>>, vector<8x1xf32>
    %cst_24 = arith.constant dense<0.000000e+00> : vector<8x128xf32>
    %27 = tpu.matmul %25, %24, %cst_24 {dimension_numbers = #tpu.dot_dimension_numbers<[1], [0], [0], [1], [0, 0, 1, 1], [], []>} : vector<8x16xf32>, vector<16x128xf32>, vector<8x128xf32> -> vector<8x128xf32>
    %28 = vector.broadcast %26 : vector<8x1xf32> to vector<8x128xf32>
    %29 = arith.addf %27, %28 : vector<8x128xf32>
    %30 = math.tanh %29 : vector<8x128xf32>
    %c0_25 = arith.constant 0 : index
    %c0_26 = arith.constant 0 : index
    %31 = vector.load %arg12[%c0_25, %c0_26] : memref<16x8xf32, #tpu.memory_space<vmem>>, vector<16x8xf32>
    %c0_27 = arith.constant 0 : index
    %c0_28 = arith.constant 0 : index
    %32 = vector.load %arg13[%c0_27, %c0_28] : memref<16x1xf32, #tpu.memory_space<vmem>>, vector<16x1xf32>
    %cst_29 = arith.constant dense<0.000000e+00> : vector<16x128xf32>
    %33 = tpu.matmul %31, %30, %cst_29 {dimension_numbers = #tpu.dot_dimension_numbers<[1], [0], [0], [1], [0, 0, 1, 1], [], []>} : vector<16x8xf32>, vector<8x128xf32>, vector<16x128xf32> -> vector<16x128xf32>
    %34 = vector.broadcast %32 : vector<16x1xf32> to vector<16x128xf32>
    %35 = arith.addf %33, %34 : vector<16x128xf32>
    %36 = math.tanh %35 : vector<16x128xf32>
    %c0_30 = arith.constant 0 : index
    %c0_31 = arith.constant 0 : index
    %37 = vector.load %arg14[%c0_30, %c0_31] : memref<32x16xf32, #tpu.memory_space<vmem>>, vector<32x16xf32>
    %c0_32 = arith.constant 0 : index
    %c0_33 = arith.constant 0 : index
    %38 = vector.load %arg15[%c0_32, %c0_33] : memref<32x1xf32, #tpu.memory_space<vmem>>, vector<32x1xf32>
    %cst_34 = arith.constant dense<0.000000e+00> : vector<32x128xf32>
    %39 = tpu.matmul %37, %36, %cst_34 {dimension_numbers = #tpu.dot_dimension_numbers<[1], [0], [0], [1], [0, 0, 1, 1], [], []>} : vector<32x16xf32>, vector<16x128xf32>, vector<32x128xf32> -> vector<32x128xf32>
    %40 = vector.broadcast %38 : vector<32x1xf32> to vector<32x128xf32>
    %41 = arith.addf %39, %40 : vector<32x128xf32>
    %42 = math.tanh %41 : vector<32x128xf32>
    %c0_35 = arith.constant 0 : index
    %c0_36 = arith.constant 0 : index
    %43 = vector.load %arg16[%c0_35, %c0_36] : memref<48x32xf32, #tpu.memory_space<vmem>>, vector<48x32xf32>
    %c0_37 = arith.constant 0 : index
    %c0_38 = arith.constant 0 : index
    %44 = vector.load %arg17[%c0_37, %c0_38] : memref<48x1xf32, #tpu.memory_space<vmem>>, vector<48x1xf32>
    %cst_39 = arith.constant dense<0.000000e+00> : vector<48x128xf32>
    %45 = tpu.matmul %43, %42, %cst_39 {dimension_numbers = #tpu.dot_dimension_numbers<[1], [0], [0], [1], [0, 0, 1, 1], [], []>} : vector<48x32xf32>, vector<32x128xf32>, vector<48x128xf32> -> vector<48x128xf32>
    %46 = vector.broadcast %44 : vector<48x1xf32> to vector<48x128xf32>
    %47 = arith.addf %45, %46 : vector<48x128xf32>
    %48 = math.tanh %47 : vector<48x128xf32>
    %c0_40 = arith.constant 0 : index
    %c0_41 = arith.constant 0 : index
    %49 = vector.load %arg18[%c0_40, %c0_41] : memref<64x48xf32, #tpu.memory_space<vmem>>, vector<64x48xf32>
    %c0_42 = arith.constant 0 : index
    %c0_43 = arith.constant 0 : index
    %50 = vector.load %arg19[%c0_42, %c0_43] : memref<64x1xf32, #tpu.memory_space<vmem>>, vector<64x1xf32>
    %cst_44 = arith.constant dense<0.000000e+00> : vector<64x128xf32>
    %51 = tpu.matmul %49, %48, %cst_44 {dimension_numbers = #tpu.dot_dimension_numbers<[1], [0], [0], [1], [0, 0, 1, 1], [], []>} : vector<64x48xf32>, vector<48x128xf32>, vector<64x128xf32> -> vector<64x128xf32>
    %52 = vector.broadcast %50 : vector<64x1xf32> to vector<64x128xf32>
    %53 = arith.addf %51, %52 : vector<64x128xf32>
    %54 = math.tanh %53 : vector<64x128xf32>
    %c0_45 = arith.constant 0 : index
    %c0_46 = arith.constant 0 : index
    %55 = vector.load %arg20[%c0_45, %c0_46] : memref<32x64xf32, #tpu.memory_space<vmem>>, vector<32x64xf32>
    %c0_47 = arith.constant 0 : index
    %c0_48 = arith.constant 0 : index
    %56 = vector.load %arg21[%c0_47, %c0_48] : memref<32x1xf32, #tpu.memory_space<vmem>>, vector<32x1xf32>
    %cst_49 = arith.constant dense<0.000000e+00> : vector<32x128xf32>
    %57 = tpu.matmul %55, %54, %cst_49 {dimension_numbers = #tpu.dot_dimension_numbers<[1], [0], [0], [1], [0, 0, 1, 1], [], []>} : vector<32x64xf32>, vector<64x128xf32>, vector<32x128xf32> -> vector<32x128xf32>
    %58 = vector.broadcast %56 : vector<32x1xf32> to vector<32x128xf32>
    %59 = arith.addf %57, %58 : vector<32x128xf32>
    %c0_50 = arith.constant 0 : index
    %c0_51 = arith.constant 0 : index
    %60 = vector.load %arg22[%c0_50, %c0_51] : memref<32x128xf32, #tpu.memory_space<vmem>>, vector<32x128xf32>
    tpu.vector_store %arg22[%c0_50, %c0_51], %59 {strides = array<i32>} : memref<32x128xf32, #tpu.memory_space<vmem>>, vector<32x128xf32>,
    return
  }
  func.func @transform_0(%arg0: i32) -> (i32, i32) {
    %c0_i32 = arith.constant 0 : i32
    %c0_i32_0 = arith.constant 0 : i32
    return %c0_i32, %arg0 : i32, i32
  }
  func.func @transform_1(%arg0: i32) -> (i32, i32) {
    %c0_i32 = arith.constant 0 : i32
    %c0_i32_0 = arith.constant 0 : i32
    %c0_i32_1 = arith.constant 0 : i32
    return %c0_i32, %c0_i32_0 : i32, i32
  }
  func.func @transform_2(%arg0: i32) -> (i32, i32) {
    %c0_i32 = arith.constant 0 : i32
    %c0_i32_0 = arith.constant 0 : i32
    %c0_i32_1 = arith.constant 0 : i32
    return %c0_i32, %c0_i32_0 : i32, i32
  }
  func.func @transform_3(%arg0: i32) -> (i32, i32) {
    %c0_i32 = arith.constant 0 : i32
    %c0_i32_0 = arith.constant 0 : i32
    %c0_i32_1 = arith.constant 0 : i32
    return %c0_i32, %c0_i32_0 : i32, i32
  }
  func.func @transform_4(%arg0: i32) -> (i32, i32) {
    %c0_i32 = arith.constant 0 : i32
    %c0_i32_0 = arith.constant 0 : i32
    %c0_i32_1 = arith.constant 0 : i32
    return %c0_i32, %c0_i32_0 : i32, i32
  }
  func.func @transform_5(%arg0: i32) -> (i32, i32) {
    %c0_i32 = arith.constant 0 : i32
    %c0_i32_0 = arith.constant 0 : i32
    %c0_i32_1 = arith.constant 0 : i32
    return %c0_i32, %c0_i32_0 : i32, i32
  }
  func.func @transform_6(%arg0: i32) -> (i32, i32) {
    %c0_i32 = arith.constant 0 : i32
    %c0_i32_0 = arith.constant 0 : i32
    %c0_i32_1 = arith.constant 0 : i32
    return %c0_i32, %c0_i32_0 : i32, i32
  }
  func.func @transform_7(%arg0: i32) -> (i32, i32) {
    %c0_i32 = arith.constant 0 : i32
    %c0_i32_0 = arith.constant 0 : i32
    %c0_i32_1 = arith.constant 0 : i32
    return %c0_i32, %c0_i32_0 : i32, i32
  }
  func.func @transform_8(%arg0: i32) -> (i32, i32) {
    %c0_i32 = arith.constant 0 : i32
    %c0_i32_0 = arith.constant 0 : i32
    %c0_i32_1 = arith.constant 0 : i32
    return %c0_i32, %c0_i32_0 : i32, i32
  }
  func.func @transform_9(%arg0: i32) -> (i32, i32) {
    %c0_i32 = arith.constant 0 : i32
    %c0_i32_0 = arith.constant 0 : i32
    %c0_i32_1 = arith.constant 0 : i32
    return %c0_i32, %c0_i32_0 : i32, i32
  }
  func.func @transform_10(%arg0: i32) -> (i32, i32) {
    %c0_i32 = arith.constant 0 : i32
    %c0_i32_0 = arith.constant 0 : i32
    %c0_i32_1 = arith.constant 0 : i32
    return %c0_i32, %c0_i32_0 : i32, i32
  }
  func.func @transform_11(%arg0: i32) -> (i32, i32) {
    %c0_i32 = arith.constant 0 : i32
    %c0_i32_0 = arith.constant 0 : i32
    %c0_i32_1 = arith.constant 0 : i32
    return %c0_i32, %c0_i32_0 : i32, i32
  }
  func.func @transform_12(%arg0: i32) -> (i32, i32) {
    %c0_i32 = arith.constant 0 : i32
    %c0_i32_0 = arith.constant 0 : i32
    %c0_i32_1 = arith.constant 0 : i32
    return %c0_i32, %c0_i32_0 : i32, i32
  }
  func.func @transform_13(%arg0: i32) -> (i32, i32) {
    %c0_i32 = arith.constant 0 : i32
    %c0_i32_0 = arith.constant 0 : i32
    %c0_i32_1 = arith.constant 0 : i32
    return %c0_i32, %c0_i32_0 : i32, i32
  }
  func.func @transform_14(%arg0: i32) -> (i32, i32) {
    %c0_i32 = arith.constant 0 : i32
    %c0_i32_0 = arith.constant 0 : i32
    %c0_i32_1 = arith.constant 0 : i32
    return %c0_i32, %c0_i32_0 : i32, i32
  }
  func.func @transform_15(%arg0: i32) -> (i32, i32) {
    %c0_i32 = arith.constant 0 : i32
    %c0_i32_0 = arith.constant 0 : i32
    %c0_i32_1 = arith.constant 0 : i32
    return %c0_i32, %c0_i32_0 : i32, i32
  }
  func.func @transform_16(%arg0: i32) -> (i32, i32) {
    %c0_i32 = arith.constant 0 : i32
    %c0_i32_0 = arith.constant 0 : i32
    %c0_i32_1 = arith.constant 0 : i32
    return %c0_i32, %c0_i32_0 : i32, i32
  }
  func.func @transform_17(%arg0: i32) -> (i32, i32) {
    %c0_i32 = arith.constant 0 : i32
    %c0_i32_0 = arith.constant 0 : i32
    %c0_i32_1 = arith.constant 0 : i32
    return %c0_i32, %c0_i32_0 : i32, i32
  }
  func.func @transform_18(%arg0: i32) -> (i32, i32) {
    %c0_i32 = arith.constant 0 : i32
    %c0_i32_0 = arith.constant 0 : i32
    %c0_i32_1 = arith.constant 0 : i32
    return %c0_i32, %c0_i32_0 : i32, i32
  }
  func.func @transform_19(%arg0: i32) -> (i32, i32) {
    %c0_i32 = arith.constant 0 : i32
    %c0_i32_0 = arith.constant 0 : i32
    %c0_i32_1 = arith.constant 0 : i32
    return %c0_i32, %c0_i32_0 : i32, i32
  }
  func.func @transform_20(%arg0: i32) -> (i32, i32) {
    %c0_i32 = arith.constant 0 : i32
    %c0_i32_0 = arith.constant 0 : i32
    %c0_i32_1 = arith.constant 0 : i32
    return %c0_i32, %c0_i32_0 : i32, i32
  }
  func.func @transform_21(%arg0: i32) -> (i32, i32) {
    %c0_i32 = arith.constant 0 : i32
    %c0_i32_0 = arith.constant 0 : i32
    return %c0_i32, %arg0 : i32, i32
  }
}

</mosaic_0001>

<bundles_post_ra>
// kernel: tpu_custom_call.1
= control target key start
LH: loop header
LB: loop body
LE: loop exit
PB: predicated region body
PF: predicated region fallthrough
CT: control target
= control target key end

     0   :  { %s3295_s0 = inlined_call_operand.vmem [shape: f32[32,256], index: 0, kind: input, shape index: {}]   ;;  %s3296_s1 = inlined_call_operand.vmem [shape: f32[64,32], index: 1, kind: input, shape index: {}]   ;;  %s3297_s2 = inlined_call_operand.vmem [shape: f32[64,1], index: 2, kind: input, shape index: {}]   ;;  %s3298_s3 = inlined_call_operand.vmem [shape: f32[48,64], index: 3, kind: input, shape index: {}]   ;;  %s3299_s4 = inlined_call_operand.vmem [shape: f32[48,1], index: 4, kind: input, shape index: {}]   ;;  %s3300_s5 = inlined_call_operand.vmem [shape: f32[32,48], index: 5, kind: input, shape index: {}]   ;;  %s3301_s6 = inlined_call_operand.vmem [shape: f32[32,1], index: 6, kind: input, shape index: {}]   ;;  %s3302_s7 = inlined_call_operand.vmem [shape: f32[16,32], index: 7, kind: input, shape index: {}]   ;;  %s3303_s8 = inlined_call_operand.vmem [shape: f32[16,1], index: 8, kind: input, shape index: {}]   ;;  %s3304_s9 = inlined_call_operand.vmem [shape: f32[8,16], index: 9, kind: input, shape index: {}]   ;;  %s3305_s10 = inlined_call_operand.vmem [shape: f32[8,1], index: 10, kind: input, shape index: {}]   ;;  %s3306_s11 = inlined_call_operand.vmem [shape: f32[16,8], index: 11, kind: input, shape index: {}]   ;;  %s3307_s12 = inlined_call_operand.vmem [shape: f32[16,1], index: 12, kind: input, shape index: {}]   ;;  %s3308_s13 = inlined_call_operand.vmem [shape: f32[32,16], index: 13, kind: input, shape index: {}]   ;;  %s3309_s14 = inlined_call_operand.vmem [shape: f32[32,1], index: 14, kind: input, shape index: {}]   ;;  %s3310_s15 = inlined_call_operand.vmem [shape: f32[48,32], index: 15, kind: input, shape index: {}]   ;;  %s3311_s16 = inlined_call_operand.vmem [shape: f32[48,1], index: 16, kind: input, shape index: {}]   ;;  %s3312_s17 = inlined_call_operand.vmem [shape: f32[64,48], index: 17, kind: input, shape index: {}]   ;;  %s3313_s18 = inlined_call_operand.vmem [shape: f32[64,1], index: 18, kind: input, shape index: {}]   ;;  %s3314_s19 = inlined_call_operand.vmem [shape: f32[32,64], index: 19, kind: input, shape index: {}]   ;;  %s3315_s20 = inlined_call_operand.vmem [shape: f32[32,1], index: 20, kind: input, shape index: {}]   ;;  %s3316_s21 = inlined_call_operand.hbm [shape: f32[32,256], index: 21, kind: output, shape index: {}]  }
   0x1   :  { %3332 = sst [smem:[#allocation11_spill]] %s3295_s0 }
   0x2   :  { %3333 = sst [smem:[#allocation12_spill]] %s3296_s1 }
   0x3   :  { %3334 = sst [smem:[#allocation13_spill]] %s3297_s2 }
   0x4   :  { %3335 = sst [smem:[#allocation14_spill]] %s3298_s3 }
   0x5   :  { %3336 = sst [smem:[#allocation15_spill]] %s3299_s4 }
   0x6   :  { %3337 = sst [smem:[#allocation16_spill]] %s3300_s5 }
   0x7   :  { %3338 = sst [smem:[#allocation17_spill]] %s3301_s6 }
   0x8   :  { %3339 = sst [smem:[#allocation18_spill]] %s3302_s7 }
   0x9   :  { %3340 = sst [smem:[#allocation19_spill]] %s3303_s8 }
   0xa   :  { %3341 = sst [smem:[#allocation20_spill]] %s3304_s9 }
   0xb   :  { %3342 = sst [smem:[#allocation21_spill]] %s3316_s21 }
   0xc   :  { %26 = vsyncpa [#allocation4], 0 }
   0xd   :  { %28 = vsyncpa [#allocation4 + $0x1], 0  ;;  %s2866_s2 = smov 0   ;;  %s2868_s25 = smov 0  }
   0xe   :  { %s2870_s26 = smov 0   ;;  %s2872_s27 = smov 0  }
   0xf LB: > { %3343 = sst [smem:[#allocation6_spill]] %s2734_s2  ;;  %s3322_s3 = sadd.s32 4294967295, %s2746_s27   ;;  %s2746_s27 = sphi %s2872_s27, %s3367_s27   ;;  %s2742_s26 = sphi %s2870_s26, %s3369_s26   ;;  %s2738_s25 = sphi %s2868_s25, %s3371_s25   ;;  %s2734_s2 = sphi %s2866_s2, %s3370_s2  }
  0x10   : > { %3344 = sst [smem:[#allocation7_spill]] %s2742_s26  ;;  %s2161_s28 = sadd.s32 4294967294, %s2746_s27  }
  0x11   : > { %s2889_s29 = sadd.s32 1, %s2746_s27   ;;  %s41_s0 = sadd.s32 1, %s2742_s26 }
  0x12   : > { %3345 = sst [smem:[#allocation8_spill]] %s2889_s29  ;;  %s38_s4 = ssub.s32 %s2746_s27, %s2889_s29 }
  0x13   : > { %p48_p0 = scmp.ne.s32.totalorder %s2742_s26, %s2738_s25  ;;  %p39_p1 = scmp.eq.s32.totalorder %s38_s4, 0 }
  0x14   : > { %p49_p2 = scmp.eq.s32.totalorder %s2746_s27, 0  ;;  %p498_p3 = scmp.eq.s32.totalorder %s3322_s3, 1 }
  0x15   : > { %p503_p4 = scmp.ne.s32.totalorder %s2738_s25, %s2734_s2  ;;  %p504_p7 = scmp.eq.s32.totalorder %s2161_s28, 1 }
  0x16   : > { %s2902_s30 = scalar_select %p39_p1, %s2742_s26, %s41_s0  }
  0x17   : > { %p50_p5 = por %p49_p2, %p48_p0  ;;  %p2904_p6 = por %p498_p3, %p48_p0 }
  0x18   : > { %3346 = sst [smem:[#allocation9_spill]] %s2902_s30  ;;  %p2908_p8 = por %p504_p7, %p503_p4 }
  0x19   : > { %p2163_p9 = scmp.ge.s32.totalorder %s2746_s27, 2 }
  0x1a   : > { %s3348_s22 = scalar_select %p2908_p8, 1, 0 }
  0x1b   : > { %580 = sbr.rel (%p2163_p9) target bundleno = 46 (0x2e), region = 96 }
  0x1c   : > { %3349 = sst [smem:[#allocation10_spill]] %s3348_s22 }
  0x22   : > { %583 = sbr.rel (!%p50_p5) target bundleno = 46 (0x2e), region = 100  ;;  %s585_s23 = sand.u32 (%p50_p5), 1, %s2742_s26  }
  0x23   : > { %s2165_s1 = sshll.u32 (%p50_p5), %s2746_s27, 3  ;;  %s2164_s24 = sshll.u32 (%p50_p5), %s585_s23, 5 }
  0x24   : > { %s3350_s3 = sld [smem:[#allocation11_spill]] (%p50_p5)  ;;  %s587_s28 = scalar_lea.vmem (%p50_p5), [#allocation2], %s2164_s24 }
  0x2a   : > { %s589_s30 = scalar_lea.vmem %s3350_s3, %s2165_s1 }
  0x2b   : > { %v623_v0 = vld [vmem:[%s589_s30] sm:$0xff]  ;;  %v625_v1 = vld [vmem:[%s589_s30 + $0x10] sm:$0xff] }
  0x2c   : > { %v627_v2 = vld [vmem:[%s589_s30 + $0x20] sm:$0xff]  ;;  %624 = vst [vmem:[%s587_s28] sm:$0xff] %v623_v0  ;;  %626 = vst [vmem:[%s587_s28 + $0x8] sm:$0xff] %v625_v1  ;;  %v629_v3 = vld [vmem:[%s589_s30 + $0x30] sm:$0xff] }
  0x2d   : > { %628 = vst [vmem:[%s587_s28 + $0x10] sm:$0xff] %v627_v2  ;;  %630 = vst [vmem:[%s587_s28 + $0x18] sm:$0xff] %v629_v3 }
  0x2e PF: > { %p2166_p10 = scmp.ge.s32.totalorder %s2746_s27, 1  ;;  %p635_p11 = scmp.lt.s32.totalorder %s2746_s27, 3 }
  0x30   : > { %p636_p12 = pnand %p2166_p10, %p635_p11 }
  0x31   : > { %s3327_s3 = sand.u32 (!%p636_p12), 1, %s2738_s25   ;;  %s3351_s0 = sld [smem:[#allocation13_spill]] (!%p636_p12)  ;;  %vm761_vm0 = vcmask (!%p636_p12), 261120   ;;  %v2748_v6 = vmov (!%p636_p12), 0   ;;  %v1289_v39 = vld [vmem:[%s3305_s10] sm:$0xff] (!%p636_p12)  ;;  %v1373_v41 = vld [vmem:[%s3307_s12 + $0x8] sm:$0xff] (!%p636_p12) }
  0x32   : > { %639 = sbr.rel (%p636_p12) target bundleno = 2433 (0x981), region = 138  ;;  %s3352_s26 = sld [smem:[#allocation12_spill]] (!%p636_p12)  ;;  %2600 = vset.pattern.permute.xlu0 (!%p636_p12), %v2748_v6  ;;  %2601 = vset.pattern.permute.xlu1 (!%p636_p12), %v2748_v6  ;;  %v1372_v40 = vld [vmem:[%s3307_s12] sm:$0xff] (!%p636_p12)  ;;  %v1473_v43 = vld [vmem:[%s3309_s14 + $0x8] sm:$0xff] (!%p636_p12)  ;;  %v1474_v44 = vld [vmem:[%s3309_s14 + $0x10] sm:$0xff] (!%p636_p12)  ;;  %vm941_vm1 = vcmask (!%p636_p12), 523264  }
  0x33   : > { %s2931_s30 = sshll.u32 (!%p636_p12), %s3327_s3, 5  ;;  %s3354_s24 = sld [smem:[#allocation15_spill]] (!%p636_p12)  ;;  %v1472_v42 = vld [vmem:[%s3309_s14] sm:$0xff] (!%p636_p12)  ;;  %v1475_v45 = vld [vmem:[%s3309_s14 + $0x18] sm:$0xff] (!%p636_p12)  ;;  %v1604_v47 = vld [vmem:[%s3311_s16 + $0x8] sm:$0xff] (!%p636_p12)  ;;  %vm1089_vm2 = vcmask (!%p636_p12), 392192  }
  0x34   : > { %s3355_s6 = sld [smem:[#allocation17_spill]] (!%p636_p12)  ;;  %s3356_s8 = sld [smem:[#allocation19_spill]] (!%p636_p12)  ;;  %v1603_v46 = vld [vmem:[%s3311_s16] sm:$0xff] (!%p636_p12)  ;;  %v1605_v48 = vld [vmem:[%s3311_s16 + $0x10] sm:$0xff] (!%p636_p12)  ;;  %v1606_v49 = vld [vmem:[%s3311_s16 + $0x18] sm:$0xff] (!%p636_p12)  ;;  %vm2750_vm3 = vmmov (!%p636_p12), 0  }
  0x35   : > { %v1607_v50 = vld [vmem:[%s3311_s16 + $0x20] sm:$0xff] (!%p636_p12)  ;;  %v1608_v51 = vld [vmem:[%s3311_s16 + $0x28] sm:$0xff] (!%p636_p12)  ;;  %v1768_v54 = vld [vmem:[%s3313_s18 + $0x10] sm:$0xff] (!%p636_p12)  ;;  %s3357_s28 = sld [smem:[#allocation14_spill]] (!%p636_p12)  ;;  %s3359_s7 = sld [smem:[#allocation18_spill]] (!%p636_p12)  ;;  %vm1295_vm4 = vcmask (!%p636_p12), 130048  }
  0x36   : > { %v1766_v52 = vld [vmem:[%s3313_s18] sm:$0xff] (!%p636_p12)  ;;  %v1767_v53 = vld [vmem:[%s3313_s18 + $0x8] sm:$0xff] (!%p636_p12)  ;;  %v1769_v55 = vld [vmem:[%s3313_s18 + $0x18] sm:$0xff] (!%p636_p12)  ;;  %s3360_s9 = sld [smem:[#allocation20_spill]] (!%p636_p12)  ;;  %vm1384_vm5 = vcmask (!%p636_p12), 64512   ;;  %s700_s22 = scalar_lea.vmem (!%p636_p12), [#allocation3], %s2931_s30 }
  0x37   : > { %v713_v4 = vld [vmem:[%s3351_s0] sm:$0xff] (!%p636_p12)  ;;  %v715_v7 = vld [vmem:[%s3351_s0 + $0x10] sm:$0xff] (!%p636_p12)  ;;  %v714_v8 = vld [vmem:[%s3351_s0 + $0x8] sm:$0xff] (!%p636_p12)  ;;  %s2093_s3 = sshll.u32 (!%p636_p12), %s700_s22, 4  ;;  %s3361_s23 = sadd.s32 (!%p636_p12), 4294967295, %s2746_s27   ;;  %s3244_s3 = int_to_ptr.vmem [resolvable:$true] %s2093_s3 }
  0x38   : > { %s3353_s29 = smov (!%p636_p12), %s3352_s26  ;;  %v705_v5 = vld [vmem:[%s3352_s26] sm:$0xff] (!%p636_p12)  ;;  %723 = vperm.xlu0 (!%p636_p12), %2600, %v713_v4   ;;  %s644_s26 = scalar_lea.vmem (!%p636_p12), [#allocation2], %s2931_s30  ;;  %733 = vperm.xlu1 (!%p636_p12), %2601, %v715_v7   ;;  %v716_v14 = vld [vmem:[%s3351_s0 + $0x18] sm:$0xff] (!%p636_p12)  ;;  %v718_v17 = vld [vmem:[%s3351_s0 + $0x28] sm:$0xff] (!%p636_p12) }
  0x39   : > { %2316 = vmatprep.mubr.msk.f32.mxu0 %vm761_vm0, %v705_v5  ;;  %v701_v9 = vld [vmem:[%s644_s26] sm:$0xff]  ;;  %v702_v10 = vld [vmem:[%s644_s26 + $0x8] sm:$0xff]  ;;  %v703_v11 = vld [vmem:[%s644_s26 + $0x10] sm:$0xff]  ;;  %s2215_s1 = sshll.u32 %s3361_s23, 7  ;;  %s3362_s2 = sld [smem:[#allocation21_spill]] }
  0x3a   : > { %v2467_v12 = vpack.c.bf16 %v702_v10, %v701_v9  ;;  %v704_v13 = vld [vmem:[%s644_s26 + $0x18] sm:$0xff]  ;;  %v717_v16 = vld [vmem:[%s3351_s0 + $0x20] sm:$0xff]  ;;  %v706_v18 = vld [vmem:[%s3353_s29 + $0x8] sm:$0xff]  ;;  %s3364_s23 = sand.u32 1, %s2738_s25  }
  0x3b   : > { %v2471_v15 = vpack.c.bf16 %v704_v13, %v703_v11  ;;  %v719_v19 = vld [vmem:[%s3351_s0 + $0x30] sm:$0xff]  ;;  %v720_v21 = vld [vmem:[%s3351_s0 + $0x38] sm:$0xff]  ;;  %v905_v23 = vld [vmem:[%s3354_s24] sm:$0xff]  ;;  %s3358_s0 = sld [smem:[#allocation16_spill]] }
  0x3c   : > { %2468 = vmatprep.subr.bf16.mxu0 %v2467_v12  ;;  %728 = vperm.xlu0 %2600, %v714_v8   ;;  %v707_v20 = vld [vmem:[%s3353_s29 + $0x10] sm:$0xff]  ;;  %v708_v22 = vld [vmem:[%s3353_s29 + $0x18] sm:$0xff]  ;;  %v709_v24 = vld [vmem:[%s3353_s29 + $0x20] sm:$0xff] }
  0x3d   : > { %2470 = vmatpush3.bf16.msra.mxu0 %v2467_v12  ;;  %738 = vperm.xlu1 %2601, %v716_v14   ;;  %v906_v25 = vld [vmem:[%s3354_s24 + $0x8] sm:$0xff]  ;;  %v907_v27 = vld [vmem:[%s3354_s24 + $0x10] sm:$0xff]  ;;  %v908_v29 = vld [vmem:[%s3354_s24 + $0x18] sm:$0xff] }
  0x3e   : > { %2472 = vmatprep.subr.bf16.mxu0 %v2471_v15  ;;  %v710_v26 = vld [vmem:[%s3353_s29 + $0x28] sm:$0xff]  ;;  %v711_v28 = vld [vmem:[%s3353_s29 + $0x30] sm:$0xff]  ;;  %v712_v30 = vld [vmem:[%s3353_s29 + $0x38] sm:$0xff] }
  0x3f   : > { %v909_v31 = vld [vmem:[%s3354_s24 + $0x20] sm:$0xff]  ;;  %v910_v32 = vld [vmem:[%s3354_s24 + $0x28] sm:$0xff]  ;;  %v1067_v35 = vld [vmem:[%s3355_s6 + $0x10] sm:$0xff]  ;;  %s3363_s4 = smov %s3362_s2  ;;  %s3249_s21 = scalar_lea.hbm %s3362_s2, %s2215_s1 }
  0x40   : > { %743 = vperm.xlu0 %2600, %v717_v16   ;;  %v1065_v33 = vld [vmem:[%s3355_s6] sm:$0xff]  ;;  %v1066_v34 = vld [vmem:[%s3355_s6 + $0x8] sm:$0xff]  ;;  %v1068_v36 = vld [vmem:[%s3355_s6 + $0x18] sm:$0xff]  ;;  %s2684_s6 = scalar_lea.vmem %s3244_s3, 512 }
  0x41   : > { %2474 = vmatpush3.bf16.msra.mxu0 %v2471_v15  ;;  %748 = vperm.xlu1 %2601, %v718_v17   ;;  %v1193_v37 = vld [vmem:[%s3356_s8] sm:$0xff]  ;;  %v1194_v38 = vld [vmem:[%s3356_s8 + $0x8] sm:$0xff]  ;;  %v1772_v58 = vld [vmem:[%s3313_s18 + $0x30] sm:$0xff]  ;;  %p2685_p13 = scmp.ne.s32.totalorder %s3244_s3, %s2684_s6 }
  0x42   : > { %v1770_v56 = vld [vmem:[%s3313_s18 + $0x20] sm:$0xff]  ;;  %v1771_v57 = vld [vmem:[%s3313_s18 + $0x28] sm:$0xff]  ;;  %v1773_v59 = vld [vmem:[%s3313_s18 + $0x38] sm:$0xff] }
  0x43   : > { %v1955_v60 = vld [vmem:[%s3315_s20] sm:$0xff]  ;;  %v1956_v61 = vld [vmem:[%s3315_s20 + $0x8] sm:$0xff]  ;;  %v1957_v62 = vld [vmem:[%s3315_s20 + $0x10] sm:$0xff]  ;;  %p2686_p0 = pnand %p2685_p13, %p2904_p6 }
  0x44   : > { %2317 = vmatmul.mubr.msk.f32.vlgmr.msra.gmra.mrb[0].mxu0 %vm761_vm0, %v706_v18  ;;  %753 = vperm.xlu0 %2600, %v719_v19   ;;  %v1958_v63 = vld [vmem:[%s3315_s20 + $0x18] sm:$0xff]  ;;  %v899_v0 = vld [vmem:[%s3357_s28] sm:$0xff] }
  0x45   : > { %2319 = vmatprep.mubr.msk.f32.mxu0 %vm761_vm0, %v707_v20  ;;  %758 = vperm.xlu1 %2601, %v720_v21   ;;  %p2687_p1 = pneg %p2686_p0 }
  0x46   : > { %2344 = vmatprep.mubr.msk.f32.mxu1 %vm941_vm1, %v899_v0 }
  0x48   : > { %2320 = vmatmul.mubr.msk.f32.gmra.mrb[2].mxu0 %vm761_vm0, %v708_v22  ;;  %913 = vperm.xlu0 %2600, %v905_v23  }
  0x49   : > { %2322 = vmatprep.mubr.msk.f32.mxu0 %vm761_vm0, %v709_v24  ;;  %918 = vperm.xlu1 %2601, %v906_v25  }
  0x4c   : > { %2323 = vmatmul.mubr.msk.f32.gmra.mrb[4].mxu0 %vm761_vm0, %v710_v26  ;;  %923 = vperm.xlu0 %2600, %v907_v27  }
  0x4d   : > { %2325 = vmatprep.mubr.msk.f32.mxu0 %vm761_vm0, %v711_v28  ;;  %928 = vperm.xlu1 %2601, %v908_v29  }
  0x50   : > { %2326 = vmatmul.mubr.msk.f32.gmra.mrb[6].mxu0 %vm761_vm0, %v712_v30  ;;  %933 = vperm.xlu0 %2600, %v909_v31  }
  0x51   : > { %938 = vperm.xlu1 %2601, %v910_v32  }
  0x54   : > { %1071 = vperm.xlu0 %2600, %v1065_v33  }
  0x55   : > { %1076 = vperm.xlu1 %2601, %v1066_v34  }
  0x58   : > { %1081 = vperm.xlu0 %2600, %v1067_v35  }
  0x59   : > { %1086 = vperm.xlu1 %2601, %v1068_v36  }
  0x5c   : > { %1197 = vperm.xlu0 %2600, %v1193_v37   ;;  %v900_v37 = vld [vmem:[%s3357_s28 + $0x8] sm:$0xff] }
  0x5d   : > { %1202 = vperm.xlu1 %2601, %v1194_v38   ;;  %v901_v38 = vld [vmem:[%s3357_s28 + $0x10] sm:$0xff] }
  0x60   : > { %1292 = vperm.xlu0 %2600, %v1289_v39   ;;  %v902_v39 = vld [vmem:[%s3357_s28 + $0x18] sm:$0xff] }
  0x61   : > { %1376 = vperm.xlu1 %2601, %v1372_v40   ;;  %v903_v40 = vld [vmem:[%s3357_s28 + $0x20] sm:$0xff] }
  0x64   : > { %1381 = vperm.xlu0 %2600, %v1373_v41   ;;  %v904_v41 = vld [vmem:[%s3357_s28 + $0x28] sm:$0xff] }
  0x65   : > { %1478 = vperm.xlu1 %2601, %v1472_v42   ;;  %v1061_v42 = vld [vmem:[%s3358_s0] sm:$0xff] }
  0x66   : > { %2365 = vmatprep.mubr.msk.f32.mxu0 %vm1089_vm2, %v1061_v42 }
  0x68   : > { %1483 = vperm.xlu0 %2600, %v1473_v43  }
  0x69   : > { %1488 = vperm.xlu1 %2601, %v1474_v44  }
  0x6c   : > { %1493 = vperm.xlu0 %2600, %v1475_v45  }
  0x6d   : > { %1611 = vperm.xlu1 %2601, %v1603_v46  }
  0x70   : > { %1616 = vperm.xlu0 %2600, %v1604_v47  }
  0x71   : > { %1621 = vperm.xlu1 %2601, %v1605_v48  }
  0x74   : > { %1626 = vperm.xlu0 %2600, %v1606_v49  }
  0x75   : > { %1631 = vperm.xlu1 %2601, %v1607_v50  }
  0x78   : > { %1636 = vperm.xlu0 %2600, %v1608_v51  }
  0x79   : > { %1776 = vperm.xlu1 %2601, %v1766_v52  }
  0x7c   : > { %1781 = vperm.xlu0 %2600, %v1767_v53  }
  0x7d   : > { %1786 = vperm.xlu1 %2601, %v1768_v54  }
  0x80   : > { %1791 = vperm.xlu0 %2600, %v1769_v55  }
  0x81   : > { %1796 = vperm.xlu1 %2601, %v1770_v56  }
  0x84   : > { %1801 = vperm.xlu0 %2600, %v1771_v57  }
  0x85   : > { %1806 = vperm.xlu1 %2601, %v1772_v58  }
  0x88   : > { %1811 = vperm.xlu0 %2600, %v1773_v59  }
  0x89   : > { %1961 = vperm.xlu1 %2601, %v1955_v60  }
  0x8c   : > { %1966 = vperm.xlu0 %2600, %v1956_v61  }
  0x8d   : > { %1971 = vperm.xlu1 %2601, %v1957_v62  }
  0x90   : > { %1976 = vperm.xlu0 %2600, %v1958_v63  }
  0xb7   : > { %v724_v1 = vpop.permute.xlu0 %723  ;;  %v734_v2 = vpop.permute.xlu1 %733 }
  0xbb   : > { %v729_v3 = vpop.permute.xlu0 %728 }
  0xbc   : > { %v739_v4 = vpop.permute.xlu1 %738 }
  0xbf   : > { %v744_v14 = vpop.permute.xlu0 %743 }
  0xc0   : > { %v749_v12 = vpop.permute.xlu1 %748 }
  0xc3   : > { %v754_v22 = vpop.permute.xlu0 %753 }
  0xc4   : > { %v759_v19 = vpop.permute.xlu1 %758 }
  0xc7   : > { %v914_v44 = vpop.permute.xlu0 %913 }
  0xc8   : > { %v919_v43 = vpop.permute.xlu1 %918 }
  0xcb   : > { %v924_v50 = vpop.permute.xlu0 %923 }
  0xcc   : > { %v929_v48 = vpop.permute.xlu1 %928 }
  0xcf   : > { %v934_v57 = vpop.permute.xlu0 %933 }
  0xd0   : > { %v939_v55 = vpop.permute.xlu1 %938 }
 0x117   : > { %v2318_v5 = vpop.f32.mrb[0].mxu0 }
 0x118   : > { %v858_v6 = vadd.f32 %v2318_v5, %v729_v3  ;;  %v852_v7 = vpop.f32.mrb[1].mxu0 }
 0x119   : > { %v853_v8 = vadd.f32 %v852_v7, %v724_v1  ;;  %v1063_v7 = vld [vmem:[%s3358_s0 + $0x10] sm:$0xff] }
 0x11a   : > { %2602 = vtanh.f32 %v858_v6  ;;  %v1062_v6 = vld [vmem:[%s3358_s0 + $0x8] sm:$0xff] }
 0x11b   : > { %2604 = vtanh.f32 %v853_v8  ;;  %v2321_v9 = vpop.f32.mrb[2].mxu0  ;;  %v1064_v8 = vld [vmem:[%s3358_s0 + $0x18] sm:$0xff]  ;;  %s3253_s0 = scalar_lea.sflag [#allocation4], %s3364_s23 }
 0x11c   : > { %v868_v10 = vadd.f32 %v2321_v9, %v739_v4  ;;  %v862_v11 = vpop.f32.mrb[3].mxu0  ;;  %v1191_v9 = vld [vmem:[%s3359_s7] sm:$0xff] }
 0x11d   : > { %v863_v13 = vadd.f32 %v862_v11, %v734_v2  ;;  %v1072_v11 = vpop.permute.xlu0 %1071 }
 0x11e   : > { %2606 = vtanh.f32 %v868_v10  ;;  %v1077_v10 = vpop.permute.xlu1 %1076 }
 0x11f   : > { %2608 = vtanh.f32 %v863_v13  ;;  %v2324_v15 = vpop.f32.mrb[4].mxu0 }
 0x120   : > { %v878_v16 = vadd.f32 %v2324_v15, %v749_v12  ;;  %v872_v17 = vpop.f32.mrb[5].mxu0 }
 0x121   : > { %v873_v18 = vadd.f32 %v872_v17, %v744_v14 }
 0x122   : > { %2610 = vtanh.f32 %v878_v16  ;;  %v1087_v16 = vpop.permute.xlu1 %1086 }
 0x123   : > { %2612 = vtanh.f32 %v873_v18  ;;  %v2327_v20 = vpop.f32.mrb[6].mxu0  ;;  %v1082_v18 = vpop.permute.xlu0 %1081 }
 0x124   : > { %v2603_v21 = vpop.eup %2602  ;;  %v888_v23 = vadd.f32 %v2327_v20, %v759_v19  ;;  %v882_v24 = vpop.f32.mrb[7].mxu0 }
 0x125   : > { %v2605_v25 = vpop.eup %2604  ;;  %v883_v26 = vadd.f32 %v882_v24, %v754_v22 }
 0x126   : > { %2614 = vtanh.f32 %v888_v23  ;;  %v2475_v27 = vpack.c.bf16 %v2603_v21, %v2605_v25 }
 0x127   : > { %2616 = vtanh.f32 %v883_v26 }
 0x128   : > { %v2607_v28 = vpop.eup %2606  ;;  %2476 = vmatprep.subr.bf16.mxu1 %v2475_v27 }
 0x129   : > { %v2609_v29 = vpop.eup %2608  ;;  %2478 = vmatpush3.bf16.msra.mxu1 %v2475_v27 }
 0x12a   : > { %v2479_v30 = vpack.c.bf16 %v2607_v28, %v2609_v29  ;;  %v1192_v28 = vld [vmem:[%s3359_s7 + $0x8] sm:$0xff]  ;;  %v2749_v29 = vmov 0.0|0.0   ;;  %s2752_s7 = smov [#allocation3]  }
 0x12b   : > { %s2688_s8 = sshll.u32 %s2752_s7, 4  ;;  %s2689_s8 = int_to_ptr.vmem [resolvable:$false] %s2688_s8 }
 0x12c   : > { %v2611_v31 = vpop.eup %2610  ;;  %2480 = vmatprep.subr.bf16.mxu1 %v2479_v30  ;;  %p2691_p2 = scmp.lt.s32.totalorder %s3244_s3, %s2689_s8 }
 0x12d   : > { %v2613_v32 = vpop.eup %2612  ;;  %2482 = vmatpush3.bf16.msra.mxu1 %v2479_v30  ;;  %v2751_v30 = vmov 0.0  }
 0x12e   : > { %v2483_v33 = vpack.c.bf16 %v2611_v31, %v2613_v32  ;;  %v1203_v31 = vpop.permute.xlu1 %1202 }
 0x130   : > { %v2615_v34 = vpop.eup %2614  ;;  %2484 = vmatprep.subr.bf16.mxu1 %v2483_v33 }
 0x131   : > { %v2617_v35 = vpop.eup %2616  ;;  %2486 = vmatpush3.bf16.msra.mxu1 %v2483_v33  ;;  %v1198_v33 = vpop.permute.xlu0 %1197 }
 0x132   : > { %v2487_v36 = vpack.c.bf16 %v2615_v34, %v2617_v35 }
 0x134   : > { %2488 = vmatprep.subr.bf16.mxu1 %v2487_v36 }
 0x135   : > { %2490 = vmatpush3.bf16.msra.mxu1 %v2487_v36  ;;  %v1293_v42 = vpop.permute.xlu0 %1292 }
 0x138   : > { %2345 = vmatmul.mubr.msk.f32.vlgmr.msra.gmra.mrb[0].mxu1 %vm941_vm1, %v900_v37 }
 0x139   : > { %2347 = vmatprep.mubr.msk.f32.mxu1 %vm941_vm1, %v901_v38 }
 0x13c   : > { %2348 = vmatmul.mubr.msk.f32.gmra.mrb[2].mxu1 %vm941_vm1, %v902_v39 }
 0x13d   : > { %2350 = vmatprep.mubr.msk.f32.mxu1 %vm941_vm1, %v903_v40  ;;  %v1288_v40 = vld [vmem:[%s3360_s9] sm:$0xff]  ;;  %s2690_s9 = scalar_lea.vmem %s2689_s8, 1024 }
 0x13e   : > { %p2692_p3 = scmp.lt.s32.totalorder %s2690_s9, %s2684_s6 }
 0x140   : > { %2351 = vmatmul.mubr.msk.f32.gmra.mrb[4].mxu1 %vm941_vm1, %v904_v41  ;;  %v1370_v41 = vld [vmem:[%s3306_s11] sm:$0xff]  ;;  %p2693_p4 = por %p2692_p3, %p2691_p2 }
 0x141   : > { %2379 = vmatprep.mubr.msk.f32.mxu1 %vm761_vm0, %v1191_v9 }
 0x142   : > { %p2694_p5 = pnand %p2693_p4, %p2687_p1 }
 0x20b   : > { %v2346_v45 = vpop.f32.mrb[0].mxu1 }
 0x20c   : > { %v1032_v46 = vadd.f32 %v2346_v45, %v919_v43  ;;  %v1026_v47 = vpop.f32.mrb[1].mxu1 }
 0x20d   : > { %v1027_v49 = vadd.f32 %v1026_v47, %v914_v44  ;;  %v1371_v47 = vld [vmem:[%s3306_s11 + $0x8] sm:$0xff] }
 0x20e   : > { %2618 = vtanh.f32 %v1032_v46 }
 0x20f   : > { %2620 = vtanh.f32 %v1027_v49  ;;  %v2349_v51 = vpop.f32.mrb[2].mxu1  ;;  %v1382_v49 = vpop.permute.xlu0 %1381 }
 0x210   : > { %v1042_v52 = vadd.f32 %v2349_v51, %v929_v48  ;;  %v1036_v53 = vpop.f32.mrb[3].mxu1  ;;  %v1468_v48 = vld [vmem:[%s3308_s13] sm:$0xff]  ;;  %v1377_v51 = vpop.permute.xlu1 %1376 }
 0x211   : > { %v1037_v54 = vadd.f32 %v1036_v53, %v924_v50 }
 0x212   : > { %2622 = vtanh.f32 %v1042_v52 }
 0x213   : > { %2624 = vtanh.f32 %v1037_v54  ;;  %v2352_v56 = vpop.f32.mrb[4].mxu1 }
 0x214   : > { %v1052_v58 = vadd.f32 %v2352_v56, %v939_v55  ;;  %v1046_v59 = vpop.f32.mrb[5].mxu1 }
 0x215   : > { %v1047_v60 = vadd.f32 %v1046_v59, %v934_v57  ;;  %v1470_v59 = vld [vmem:[%s3308_s13 + $0x10] sm:$0xff] }
 0x216   : > { %2626 = vtanh.f32 %v1052_v58  ;;  %v1469_v58 = vld [vmem:[%s3308_s13 + $0x8] sm:$0xff] }
 0x217   : > { %2628 = vtanh.f32 %v1047_v60  ;;  %v1471_v60 = vld [vmem:[%s3308_s13 + $0x18] sm:$0xff] }
 0x218   : > { %v2619_v61 = vpop.eup %2618 }
 0x219   : > { %v2621_v62 = vpop.eup %2620 }
 0x21a   : > { %v2491_v63 = vpack.c.bf16 %v2619_v61, %v2621_v62  ;;  %v1597_v61 = vld [vmem:[%s3310_s15] sm:$0xff]  ;;  %v1484_v62 = vpop.permute.xlu0 %1483 }
 0x21c   : > { %v2623_v0 = vpop.eup %2622  ;;  %2492 = vmatprep.subr.bf16.mxu0 %v2491_v63 }
 0x21d   : > { %v2625_v1 = vpop.eup %2624  ;;  %2494 = vmatpush3.bf16.msra.mxu0 %v2491_v63  ;;  %v1479_v63 = vpop.permute.xlu1 %1478 }
 0x21e   : > { %v2495_v2 = vpack.c.bf16 %v2623_v0, %v2625_v1 }
 0x220   : > { %v2627_v3 = vpop.eup %2626  ;;  %2496 = vmatprep.subr.bf16.mxu0 %v2495_v2 }
 0x221   : > { %v2629_v4 = vpop.eup %2628  ;;  %2498 = vmatpush3.bf16.msra.mxu0 %v2495_v2 }
 0x222   : > { %v2499_v5 = vpack.c.bf16 %v2627_v3, %v2629_v4  ;;  %v1494_v4 = vpop.permute.xlu0 %1493 }
 0x224   : > { %2500 = vmatprep.subr.bf16.mxu0 %v2499_v5 }
 0x225   : > { %2502 = vmatpush3.bf16.msra.mxu0 %v2499_v5 }
 0x226   : > { %2511 = vmatprep.subr.bf16.mxu0 %v2749_v29 }
 0x228   : > { %2366 = vmatmul.mubr.msk.f32.vlgmr.msra.gmra.mrb[8].mxu0 %vm1089_vm2, %v1062_v6  ;;  %v1489_v6 = vpop.permute.xlu1 %1488 }
 0x229   : > { %2368 = vmatprep.mubr.msk.f32.mxu0 %vm1089_vm2, %v1063_v7 }
 0x22c   : > { %2369 = vmatmul.mubr.msk.f32.gmra.mrb[10].mxu0 %vm1089_vm2, %v1064_v8 }
 0x22d   : > { %2386 = vmatprep.mubr.msk.f32.mxu0 %vm2750_vm3, %v2751_v30 }
 0x2fb   : > { %v2367_v12 = vpop.f32.mrb[8].mxu0 }
 0x2fc   : > { %v1174_v13 = vadd.f32 %v2367_v12, %v1077_v10  ;;  %v1168_v14 = vpop.f32.mrb[9].mxu0 }
 0x2fd   : > { %v1169_v15 = vadd.f32 %v1168_v14, %v1072_v11 }
 0x2fe   : > { %2630 = vtanh.f32 %v1174_v13 }
 0x2ff   : > { %2632 = vtanh.f32 %v1169_v15  ;;  %v2370_v17 = vpop.f32.mrb[10].mxu0 }
 0x300   : > { %v1184_v19 = vadd.f32 %v2370_v17, %v1087_v16  ;;  %v1178_v20 = vpop.f32.mrb[11].mxu0  ;;  %v1598_v16 = vld [vmem:[%s3310_s15 + $0x8] sm:$0xff]  ;;  %v1599_v17 = vld [vmem:[%s3310_s15 + $0x10] sm:$0xff] }
 0x301   : > { %v1179_v21 = vadd.f32 %v1178_v20, %v1082_v18  ;;  %v1600_v18 = vld [vmem:[%s3310_s15 + $0x18] sm:$0xff]  ;;  %v1602_v20 = vld [vmem:[%s3310_s15 + $0x28] sm:$0xff] }
 0x302   : > { %2634 = vtanh.f32 %v1184_v19  ;;  %v1601_v19 = vld [vmem:[%s3310_s15 + $0x20] sm:$0xff] }
 0x303   : > { %2636 = vtanh.f32 %v1179_v21  ;;  %v1758_v21 = vld [vmem:[%s3312_s17] sm:$0xff] }
 0x308   : > { %v2631_v22 = vpop.eup %2630 }
 0x309   : > { %v2633_v23 = vpop.eup %2632 }
 0x30a   : > { %v2503_v24 = vpack.c.bf16 %v2631_v22, %v2633_v23  ;;  %v1617_v22 = vpop.permute.xlu0 %1616  ;;  %v1612_v23 = vpop.permute.xlu1 %1611 }
 0x30c   : > { %v2635_v25 = vpop.eup %2634  ;;  %2504 = vmatprep.subr.bf16.mxu1 %v2503_v24 }
 0x30d   : > { %v2637_v26 = vpop.eup %2636  ;;  %2506 = vmatpush3.bf16.msra.mxu1 %v2503_v24 }
 0x30e   : > { %v2507_v27 = vpack.c.bf16 %v2635_v25, %v2637_v26  ;;  %v1622_v29 = vpop.permute.xlu1 %1621 }
 0x310   : > { %2508 = vmatprep.subr.bf16.mxu1 %v2507_v27 }
 0x311   : > { %2510 = vmatpush3.bf16.msra.mxu1 %v2507_v27  ;;  %v1627_v27 = vpop.permute.xlu0 %1626 }
 0x314   : > { %2380 = vmatmul.mubr.msk.f32.vlgmr.msra.gmra.mrb[6].mxu1 %vm761_vm0, %v1192_v28 }
 0x315   : > { %2391 = vmatprep.mubr.msk.f32.mxu1 %vm1384_vm5, %v1370_v41 }
 0x3e7   : > { %v2381_v32 = vpop.f32.mrb[6].mxu1 }
 0x3e8   : > { %v1283_v34 = vadd.f32 %v2381_v32, %v1203_v31  ;;  %v1277_v35 = vpop.f32.mrb[7].mxu1 }
 0x3e9   : > { %v1278_v36 = vadd.f32 %v1277_v35, %v1198_v33 }
 0x3ea   : > { %2638 = vtanh.f32 %v1283_v34  ;;  %v1637_v34 = vpop.permute.xlu0 %1636 }
 0x3eb   : > { %2640 = vtanh.f32 %v1278_v36  ;;  %v1632_v36 = vpop.permute.xlu1 %1631 }
 0x3f4   : > { %v2639_v37 = vpop.eup %2638 }
 0x3f5   : > { %v2641_v38 = vpop.eup %2640 }
 0x3f6   : > { %v2512_v39 = vpack.c.bf16 %v2639_v37, %v2641_v38 }
 0x3f8   : > { %2513 = vmatpush3.bf16.msra.mxu0 %v2512_v39 }
 0x3fb   : > { %2387 = vmatmul.mubr.msk.f32.vlgmr.msra.gmra.mrb[12].mxu0 %vm1295_vm4, %v1288_v40 }
 0x3fc   : > { %2398 = vmatprep.mubr.msk.f32.mxu0 %vm1295_vm4, %v1468_v48 }
 0x4ce   : > { %v1365_v43 = vpop.f32.mrb[12].mxu0 }
 0x4cf   : > { %v1366_v44 = vadd.f32 %v1365_v43, %v1293_v42  ;;  %v2388_v45 = vpop.f32.mrb[13].mxu0 }
 0x4d1   : > { %2642 = vtanh.f32 %v1366_v44 }
 0x4db   : > { %v2643_v46 = vpop.eup %2642 }
 0x4dc   : > { %2389 = vmatprep.subr.mxu1 %v2643_v46 }
 0x4dd   : > { %2390 = vmatpush3.msra.mxu1 %v2643_v46 }
 0x4de   : > { %2392 = vmatmul.mubr.msk.f32.vlgmr.msra.gmra.mrb[8].mxu1 %vm1384_vm5, %v1371_v47 }
 0x4df   : > { %2412 = vmatprep.mubr.msk.f32.mxu1 %vm761_vm0, %v1597_v61 }
 0x5b1   : > { %v2393_v50 = vpop.f32.mrb[8].mxu1 }
 0x5b2   : > { %v1463_v52 = vadd.f32 %v2393_v50, %v1382_v49  ;;  %v1457_v53 = vpop.f32.mrb[9].mxu1  ;;  %v1759_v49 = vld [vmem:[%s3312_s17 + $0x8] sm:$0xff]  ;;  %v1760_v50 = vld [vmem:[%s3312_s17 + $0x10] sm:$0xff] }
 0x5b3   : > { %v1458_v54 = vadd.f32 %v1457_v53, %v1377_v51  ;;  %v1761_v51 = vld [vmem:[%s3312_s17 + $0x18] sm:$0xff]  ;;  %v1763_v53 = vld [vmem:[%s3312_s17 + $0x28] sm:$0xff] }
 0x5b4   : > { %2644 = vtanh.f32 %v1463_v52  ;;  %v1762_v52 = vld [vmem:[%s3312_s17 + $0x20] sm:$0xff] }
 0x5b5   : > { %2646 = vtanh.f32 %v1458_v54  ;;  %v1764_v54 = vld [vmem:[%s3312_s17 + $0x30] sm:$0xff] }
 0x5be   : > { %v2645_v55 = vpop.eup %2644 }
 0x5bf   : > { %v2647_v56 = vpop.eup %2646 }
 0x5c0   : > { %v2514_v57 = vpack.c.bf16 %v2645_v55, %v2647_v56  ;;  %v1765_v55 = vld [vmem:[%s3312_s17 + $0x38] sm:$0xff]  ;;  %v1951_v56 = vld [vmem:[%s3314_s19] sm:$0xff] }
 0x5c2   : > { %2515 = vmatprep.subr.bf16.mxu0 %v2514_v57 }
 0x5c3   : > { %2517 = vmatpush3.bf16.msra.mxu0 %v2514_v57  ;;  %v1782_v57 = vpop.permute.xlu0 %1781 }
 0x5c6   : > { %2399 = vmatmul.mubr.msk.f32.vlgmr.msra.gmra.mrb[14].mxu0 %vm1295_vm4, %v1469_v58  ;;  %v1777_v58 = vpop.permute.xlu1 %1776 }
 0x5c7   : > { %2401 = vmatprep.mubr.msk.f32.mxu0 %vm1295_vm4, %v1470_v59  ;;  %v1792_v59 = vpop.permute.xlu0 %1791 }
 0x5ca   : > { %2402 = vmatmul.mubr.msk.f32.gmra.mrb[16].mxu0 %vm1295_vm4, %v1471_v60  ;;  %v1787_v61 = vpop.permute.xlu1 %1786 }
 0x5cb   : > { %2433 = vmatprep.mubr.msk.f32.mxu0 %vm1089_vm2, %v1758_v21 }
 0x699   : > { %v2400_v0 = vpop.f32.mrb[14].mxu0 }
 0x69a   : > { %v1580_v1 = vadd.f32 %v2400_v0, %v1484_v62  ;;  %v1574_v2 = vpop.f32.mrb[15].mxu0 }
 0x69b   : > { %v1575_v3 = vadd.f32 %v1574_v2, %v1479_v63 }
 0x69c   : > { %2648 = vtanh.f32 %v1580_v1 }
 0x69d   : > { %2650 = vtanh.f32 %v1575_v3  ;;  %v2403_v5 = vpop.f32.mrb[16].mxu0 }
 0x69e   : > { %v1590_v7 = vadd.f32 %v2403_v5, %v1494_v4  ;;  %v1584_v8 = vpop.f32.mrb[17].mxu0  ;;  %v1802_v4 = vpop.permute.xlu0 %1801 }
 0x69f   : > { %v1585_v9 = vadd.f32 %v1584_v8, %v1489_v6  ;;  %v1797_v6 = vpop.permute.xlu1 %1796 }
 0x6a0   : > { %2652 = vtanh.f32 %v1590_v7 }
 0x6a1   : > { %2654 = vtanh.f32 %v1585_v9 }
 0x6a6   : > { %v2649_v10 = vpop.eup %2648 }
 0x6a7   : > { %v2651_v11 = vpop.eup %2650 }
 0x6a8   : > { %v2518_v12 = vpack.c.bf16 %v2649_v10, %v2651_v11  ;;  %v1812_v11 = vpop.permute.xlu0 %1811 }
 0x6aa   : > { %v2653_v13 = vpop.eup %2652  ;;  %2519 = vmatprep.subr.bf16.mxu1 %v2518_v12 }
 0x6ab   : > { %v2655_v14 = vpop.eup %2654  ;;  %2521 = vmatpush3.bf16.msra.mxu1 %v2518_v12 }
 0x6ac   : > { %v2522_v15 = vpack.c.bf16 %v2653_v13, %v2655_v14  ;;  %v1807_v14 = vpop.permute.xlu1 %1806 }
 0x6ae   : > { %2523 = vmatprep.subr.bf16.mxu1 %v2522_v15 }
 0x6af   : > { %2525 = vmatpush3.bf16.msra.mxu1 %v2522_v15 }
 0x6b2   : > { %2413 = vmatmul.mubr.msk.f32.vlgmr.msra.gmra.mrb[10].mxu1 %vm761_vm0, %v1598_v16 }
 0x6b3   : > { %2415 = vmatprep.mubr.msk.f32.mxu1 %vm761_vm0, %v1599_v17 }
 0x6b6   : > { %2416 = vmatmul.mubr.msk.f32.gmra.mrb[12].mxu1 %vm761_vm0, %v1600_v18 }
 0x6b7   : > { %2418 = vmatprep.mubr.msk.f32.mxu1 %vm761_vm0, %v1601_v19 }
 0x6ba   : > { %2419 = vmatmul.mubr.msk.f32.gmra.mrb[14].mxu1 %vm761_vm0, %v1602_v20 }
 0x6bb   : > { %2461 = vmatprep.mubr.msk.f32.mxu1 %vm941_vm1, %v1951_v56 }
 0x785   : > { %v2414_v24 = vpop.f32.mrb[10].mxu1 }
 0x786   : > { %v1729_v25 = vadd.f32 %v2414_v24, %v1617_v22  ;;  %v1723_v26 = vpop.f32.mrb[11].mxu1 }
 0x787   : > { %v1724_v28 = vadd.f32 %v1723_v26, %v1612_v23 }
 0x788   : > { %2656 = vtanh.f32 %v1729_v25 }
 0x789   : > { %2658 = vtanh.f32 %v1724_v28  ;;  %v2417_v30 = vpop.f32.mrb[12].mxu1 }
 0x78a   : > { %v1739_v31 = vadd.f32 %v2417_v30, %v1627_v27  ;;  %v1733_v32 = vpop.f32.mrb[13].mxu1  ;;  %v1953_v30 = vld [vmem:[%s3314_s19 + $0x10] sm:$0xff] }
 0x78b   : > { %v1734_v33 = vadd.f32 %v1733_v32, %v1622_v29  ;;  %v1952_v29 = vld [vmem:[%s3314_s19 + $0x8] sm:$0xff]  ;;  %v1967_v32 = vpop.permute.xlu0 %1966 }
 0x78c   : > { %2660 = vtanh.f32 %v1739_v31  ;;  %v1954_v31 = vld [vmem:[%s3314_s19 + $0x18] sm:$0xff] }
 0x78d   : > { %2662 = vtanh.f32 %v1734_v33  ;;  %v2420_v35 = vpop.f32.mrb[14].mxu1  ;;  %v1962_v33 = vpop.permute.xlu1 %1961 }
 0x78e   : > { %v1749_v37 = vadd.f32 %v2420_v35, %v1637_v34  ;;  %v1743_v38 = vpop.f32.mrb[15].mxu1 }
 0x78f   : > { %v1744_v39 = vadd.f32 %v1743_v38, %v1632_v36  ;;  %v1977_v38 = vpop.permute.xlu0 %1976 }
 0x790   : > { %2664 = vtanh.f32 %v1749_v37 }
 0x791   : > { %2666 = vtanh.f32 %v1744_v39 }
 0x792   : > { %v2657_v40 = vpop.eup %2656 }
 0x793   : > { %v2659_v41 = vpop.eup %2658 }
 0x794   : > { %v2526_v42 = vpack.c.bf16 %v2657_v40, %v2659_v41  ;;  %v1972_v40 = vpop.permute.xlu1 %1971 }
 0x796   : > { %v2661_v43 = vpop.eup %2660  ;;  %2527 = vmatprep.subr.bf16.mxu0 %v2526_v42 }
 0x797   : > { %v2663_v44 = vpop.eup %2662  ;;  %2529 = vmatpush3.bf16.msra.mxu0 %v2526_v42 }
 0x798   : > { %v2530_v45 = vpack.c.bf16 %v2661_v43, %v2663_v44 }
 0x79a   : > { %v2665_v46 = vpop.eup %2664  ;;  %2531 = vmatprep.subr.bf16.mxu0 %v2530_v45 }
 0x79b   : > { %v2667_v47 = vpop.eup %2666  ;;  %2533 = vmatpush3.bf16.msra.mxu0 %v2530_v45 }
 0x79c   : > { %v2534_v48 = vpack.c.bf16 %v2665_v46, %v2667_v47 }
 0x79e   : > { %2535 = vmatprep.subr.bf16.mxu0 %v2534_v48 }
 0x79f   : > { %2537 = vmatpush3.bf16.msra.mxu0 %v2534_v48 }
 0x7a2   : > { %2434 = vmatmul.mubr.msk.f32.vlgmr.msra.gmra.mrb[18].mxu0 %vm1089_vm2, %v1759_v49 }
 0x7a3   : > { %2436 = vmatprep.mubr.msk.f32.mxu0 %vm1089_vm2, %v1760_v50 }
 0x7a6   : > { %2437 = vmatmul.mubr.msk.f32.gmra.mrb[20].mxu0 %vm1089_vm2, %v1761_v51 }
 0x7a7   : > { %2439 = vmatprep.mubr.msk.f32.mxu0 %vm1089_vm2, %v1762_v52 }
 0x7aa   : > { %2440 = vmatmul.mubr.msk.f32.gmra.mrb[22].mxu0 %vm1089_vm2, %v1763_v53 }
 0x7ab   : > { %2442 = vmatprep.mubr.msk.f32.mxu0 %vm1089_vm2, %v1764_v54 }
 0x7ae   : > { %2443 = vmatmul.mubr.msk.f32.gmra.mrb[24].mxu0 %vm1089_vm2, %v1765_v55 }
 0x875   : > { %v2435_v60 = vpop.f32.mrb[18].mxu0 }
 0x876   : > { %v1910_v62 = vadd.f32 %v2435_v60, %v1782_v57  ;;  %v1904_v63 = vpop.f32.mrb[19].mxu0 }
 0x877   : > { %v1905_v0 = vadd.f32 %v1904_v63, %v1777_v58 }
 0x878   : > { %2668 = vtanh.f32 %v1910_v62 }
 0x879   : > { %2670 = vtanh.f32 %v1905_v0  ;;  %v2438_v1 = vpop.f32.mrb[20].mxu0 }
 0x87a   : > { %v1920_v2 = vadd.f32 %v2438_v1, %v1792_v59  ;;  %v1914_v3 = vpop.f32.mrb[21].mxu0 }
 0x87b   : > { %v1915_v5 = vadd.f32 %v1914_v3, %v1787_v61 }
 0x87c   : > { %2672 = vtanh.f32 %v1920_v2 }
 0x87d   : > { %2674 = vtanh.f32 %v1915_v5  ;;  %v2441_v7 = vpop.f32.mrb[22].mxu0 }
 0x87e   : > { %v1930_v8 = vadd.f32 %v2441_v7, %v1802_v4  ;;  %v1924_v9 = vpop.f32.mrb[23].mxu0 }
 0x87f   : > { %v1925_v10 = vadd.f32 %v1924_v9, %v1797_v6 }
 0x880   : > { %2676 = vtanh.f32 %v1930_v8 }
 0x881   : > { %2678 = vtanh.f32 %v1925_v10  ;;  %v2444_v12 = vpop.f32.mrb[24].mxu0 }
 0x882   : > { %v2669_v13 = vpop.eup %2668  ;;  %v1940_v15 = vadd.f32 %v2444_v12, %v1812_v11  ;;  %v1934_v16 = vpop.f32.mrb[25].mxu0 }
 0x883   : > { %v2671_v17 = vpop.eup %2670  ;;  %v1935_v18 = vadd.f32 %v1934_v16, %v1807_v14 }
 0x884   : > { %2680 = vtanh.f32 %v1940_v15  ;;  %v2538_v19 = vpack.c.bf16 %v2669_v13, %v2671_v17 }
 0x885   : > { %2682 = vtanh.f32 %v1935_v18 }
 0x886   : > { %v2673_v20 = vpop.eup %2672  ;;  %2539 = vmatprep.subr.bf16.mxu1 %v2538_v19 }
 0x887   : > { %v2675_v21 = vpop.eup %2674  ;;  %2541 = vmatpush3.bf16.msra.mxu1 %v2538_v19 }
 0x888   : > { %v2542_v22 = vpack.c.bf16 %v2673_v20, %v2675_v21 }
 0x88a   : > { %v2677_v23 = vpop.eup %2676  ;;  %2543 = vmatprep.subr.bf16.mxu1 %v2542_v22 }
 0x88b   : > { %v2679_v24 = vpop.eup %2678  ;;  %2545 = vmatpush3.bf16.msra.mxu1 %v2542_v22 }
 0x88c   : > { %v2546_v25 = vpack.c.bf16 %v2677_v23, %v2679_v24 }
 0x88e   : > { %v2681_v26 = vpop.eup %2680  ;;  %2547 = vmatprep.subr.bf16.mxu1 %v2546_v25 }
 0x88f   : > { %v2683_v27 = vpop.eup %2682  ;;  %2549 = vmatpush3.bf16.msra.mxu1 %v2546_v25 }
 0x890   : > { %v2550_v28 = vpack.c.bf16 %v2681_v26, %v2683_v27 }
 0x892   : > { %2551 = vmatprep.subr.bf16.mxu1 %v2550_v28 }
 0x893   : > { %2553 = vmatpush3.bf16.msra.mxu1 %v2550_v28 }
 0x896   : > { %2462 = vmatmul.mubr.msk.f32.vlgmr.msra.gmra.mrb[16].mxu1 %vm941_vm1, %v1952_v29 }
 0x897   : > { %2464 = vmatprep.mubr.msk.f32.mxu1 %vm941_vm1, %v1953_v30 }
 0x89a   : > { %2465 = vmatmul.mubr.msk.f32.gmra.mrb[18].mxu1 %vm941_vm1, %v1954_v31 }
 0x969   : > { %v2463_v34 = vpop.f32.mrb[16].mxu1 }
 0x96a   : > { %v2063_v35 = vadd.f32 %v2463_v34, %v1967_v32  ;;  %v2057_v36 = vpop.f32.mrb[17].mxu1 }
 0x96b   : > { %v2058_v37 = vadd.f32 %v2057_v36, %v1962_v33 }
 0x96c   : > { %2077 = vst [vmem:[%s700_s22 + $0x8] sm:$0xff] %v2063_v35 }
 0x96d   : > { %2076 = vst [vmem:[%s700_s22] sm:$0xff] %v2058_v37  ;;  %v2466_v39 = vpop.f32.mrb[18].mxu1 }
 0x96e   : > { %v2073_v41 = vadd.f32 %v2466_v39, %v1977_v38  ;;  %v2067_v42 = vpop.f32.mrb[19].mxu1 }
 0x96f   : > { %v2068_v43 = vadd.f32 %v2067_v42, %v1972_v40 }
 0x970   : > { %2079 = vst [vmem:[%s700_s22 + $0x18] sm:$0xff] %v2073_v41 }
 0x971   : > { %2078 = vst [vmem:[%s700_s22 + $0x10] sm:$0xff] %v2068_v43 }
 0x972   : > { %2697 = shalt.err (!%p2694_p5)
}
 0x973   : > { %s2698_s22 = scalar_lea.hbm %s3249_s21, 512  ;;  %s2702_s7 = scalar_lea.hbm %s3363_s4, 1024 }
 0x974   : > { %p2699_p7 = scmp.ne.s32.totalorder %s3249_s21, %s2698_s22  ;;  %p2703_p12 = scmp.lt.u32.totalorder %s3249_s21, %s3363_s4 }
 0x975   : > { %p2704_p13 = scmp.lt.u32.totalorder %s2702_s7, %s2698_s22  ;;  %p2706_p1 = scmp.lt.u32.totalorder %s2698_s22, %s3249_s21 }
 0x976   : > { %p2700_p10 = pnand %p2699_p7, %p2904_p6 }
 0x977   : > { %p2705_p0 = por %p2704_p13, %p2703_p12 }
 0x978   : > { %p2701_p11 = pneg %p2700_p10 }
 0x979   : > { %p2707_p2 = por %p2706_p1, %p2705_p0 }
 0x97b   : > { %p2708_p3 = pnand %p2707_p2, %p2701_p11 }
 0x97d   : > { %2711 = shalt.err (!%p2708_p3)
}
 0x97e   : > { %s2753_s6 = smov 128   ;;  %s2754_s9 = smov 256  }
 0x97f   : > { %s2755_s2 = smov 8  }
 0x980   : > { %2554 = dma.vmem_to_hbm [thread:$0]  (%p2904_p6), %s3244_s3, 512, %s3249_s21, %s3253_s0, %s2753_s6, %s2754_s9, %s2755_s2  }
 0x981 PF: > { %s3365_s23 = sld [smem:[#allocation6_spill]]  ;;  %p2557_p4 = pnand %p2163_p9, %p2908_p8 }
 0x987   : > { %s2108_s30 = sand.u32 1, %s3365_s23  }
 0x988   : > { %s2109_s22 = scalar_lea.sflag [#allocation4], %s2108_s30 }
 0x989   : > { %2729 = dma.done.wait (!%p2557_p4), %s2109_s22, 512  }
 0x98a   : > { %2731 = vsyncadd (!%p2557_p4), %s2109_s22, 4294966784  ;;  %s3367_s27 = sld [smem:[#allocation8_spill]]  ;;  %s3368_s7 = sld [smem:[#allocation7_spill]] }
 0x98b   : > { %s3369_s26 = sld [smem:[#allocation9_spill]]  ;;  %s3370_s2 = smov %s2738_s25 }
 0x990   : > { %p31_p5 = scmp.ge.s32.totalorder %s3367_s27, 4   ;;  %s3371_s25 = smov %s3368_s7 }
 0x992   :  { %33 = sbr.rel (!%p31_p5) target bundleno = 15 (0xf), region = 182 }
 0x999   :  { %2114 = vsyncpa [#allocation4], 1 }
 0x99a   :  { %2116 = vsyncpa [#allocation4 + $0x1], 1 }

</bundles_post_ra>
